<compile_context>
chip_gen: v7x
topology: tpu7x:2x2x1
jax: 0.10.0
libtpu: 0.0.40
codegen_flags: <defaults>
</compile_context>

<pallas_src>
import jax
import jax.numpy as jnp
from jax.experimental import pallas as pl
from jax.experimental.pallas import tpu as pltpu

_LANE = 128      # vreg lane width    (last dim)
_SUBLANE = 8     # vreg sublane width (second-to-last dim)
_NEG_BIG = -1e30  # padded-class bias; exp() underflows to 0 in f32


def _round_up(x, m):
    return ((x + m - 1) // m) * m


def tensorized_net_kernel(x_ref, w1_ref, b1_ref, w2_ref, b2_ref, o_ref):
    # x_ref : (TM, D_in_pad)    bf16
    # w1_ref: (D_in_pad, H_pad) bf16,  b1_ref: (1, H_pad) f32
    # w2_ref: (H_pad, C_pad)    bf16,  b2_ref: (1, C_pad) f32 (mask baked in)
    # o_ref : (TM, C_pad) f32   (lane-dense; caller slices back to n_classes)

    # fc1: bf16 MXU operands, f32 accumulation; bias + ReLU in f32
    # (f32 elementwise path works on v5e, which has no bf16 VPU/EUP).
    h = jnp.dot(x_ref[...], w1_ref[...], preferred_element_type=jnp.float32)
    h = jnp.maximum(h + b1_ref[...], 0.0)

    # Dropout(p=0.5) in eval mode is the identity.
    # TODO(synk): training-mode dropout (random mask + 1/(1-p) scaling) not implemented.

    # fc2.  Padded class columns of w2 are zero and b2 carries -1e30 there, so
    # padded logits are exactly -1e30 and vanish from the softmax normalizer —
    # no in-kernel mask needed.
    logits = jnp.dot(h.astype(w2_ref.dtype), w2_ref[...],
                     preferred_element_type=jnp.float32) + b2_ref[...]

    # Numerically stable log_softmax over dim=1 (exp/log run on the EUP).
    m = jnp.max(logits, axis=-1, keepdims=True)
    shifted = logits - m
    lse = jnp.log(jnp.sum(jnp.exp(shifted), axis=-1, keepdims=True))
    o_ref[...] = (shifted - lse).astype(o_ref.dtype)


def prepare_tensorized_net_params(w1, b1, w2, b2):
    """One-time weight prep (hoisted out of the per-call forward path).

    w1: (D_in, H), w2: (H, n_cls) stored (in, out); biases 1-D.
    Returns padded bf16 weights + f32 biases with the padded-class mask baked
    into b2 (padded columns set to -1e30).
    """
    d_in, hidden = w1.shape
    n_cls = w2.shape[1]
    d_in_p = _round_up(d_in, _LANE)
    h_p = _round_up(hidden, _LANE)
    c_p = _round_up(n_cls, _LANE)

    w1_p = (jnp.zeros((d_in_p, h_p), jnp.float32)
            .at[:d_in, :hidden].set(jnp.asarray(w1, jnp.float32))
            .astype(jnp.bfloat16))
    b1_p = (jnp.zeros((1, h_p), jnp.float32)
            .at[:, :hidden].set(jnp.reshape(jnp.asarray(b1, jnp.float32),
                                            (1, hidden))))
    w2_p = (jnp.zeros((h_p, c_p), jnp.float32)
            .at[:hidden, :n_cls].set(jnp.asarray(w2, jnp.float32))
            .astype(jnp.bfloat16))
    # Keep b2 in f32: -1e30 is representable and exp underflows cleanly to 0.
    b2_p = (jnp.full((1, c_p), _NEG_BIG, jnp.float32)
            .at[:, :n_cls].set(jnp.reshape(jnp.asarray(b2, jnp.float32),
                                           (1, n_cls))))

    return {"w1": w1_p, "b1": b1_p, "w2": w2_p, "b2": b2_p,
            "d_in": d_in, "hidden": hidden, "n_cls": n_cls}


def tensorized_net_forward(x_nchw, params, *, tm=512):
    """x_nchw: (N, C, H, W). Returns log-probabilities (N, n_cls) in float32."""
    n = x_nchw.shape[0]
    d_in = params["d_in"]
    n_cls = params["n_cls"]
    w1_p, b1_p, w2_p, b2_p = params["w1"], params["b1"], params["w2"], params["b2"]
    d_in_p, h_p = w1_p.shape
    c_p = w2_p.shape[1]

    # --- batch tile selection -------------------------------------------
    n8 = _round_up(n, _SUBLANE)
    tm = _round_up(min(tm, n8), _SUBLANE)
    # Guarantee >= 2 grid steps for mid/large batches so ("parallel",) can
    # shard the batch across both TensorCores on v7x megacore.
    if n8 // tm < 2 and n8 >= 2 * _SUBLANE:
        tm = _round_up(-(-n8 // 2), _SUBLANE)   # ceil(n8/2) rounded up to 8
    n_p = _round_up(n, tm)
    # TODO(synk): for very large d_in on v7x (64 MiB VMEM/TC), add a K grid
    # axis ("arbitrary") with an f32 accumulator instead of full-width blocks.

    # --- x: flatten, cast to bf16 first, then pad (batch always; features
    #        only when d_in is not already lane-aligned) ----------------------
    x_bf = x_nchw.reshape(n, -1).astype(jnp.bfloat16)   # torch.flatten(x, 1)
    if n_p == n and d_in_p == d_in:
        x_p = x_bf
    else:
        x_p = jnp.zeros((n_p, d_in_p), jnp.bfloat16).at[:n, :d_in].set(x_bf)

    grid = (n_p // tm,)

    # --- VMEM budget: double-buffered x/out tiles + resident weights ------
    x_tile_bytes = tm * d_in_p * 2
    out_tile_bytes = tm * c_p * 4
    weight_bytes = (w1_p.size + w2_p.size) * 2 + (b1_p.size + b2_p.size) * 4
    needed = 2 * (x_tile_bytes + out_tile_bytes) + 2 * weight_bytes
    vmem_limit = int(min(64 << 20, max(4 * needed, 16 << 20)))  # safe on v5e/v6e/v7x

    cost = pl.CostEstimate(
        flops=2 * n_p * (d_in_p * h_p + h_p * c_p),
        transcendentals=n_p * (c_p + 1),
        bytes_accessed=(x_p.size * 2 + w1_p.size * 2 + w2_p.size * 2
                        + b1_p.size * 4 + b2_p.size * 4 + n_p * c_p * 4),
    )

    x_spec = pl.BlockSpec((tm, d_in_p), lambda i: (i, 0))
    out_spec = pl.BlockSpec((tm, c_p), lambda i: (i, 0))

    def _weight_specs(single_buffer):
        # Constant index_map -> weights stay resident in VMEM; single-buffer
        # them (no pipelining needed) to halve their VMEM footprint.
        kw = dict(pipeline_mode=pl.Buffered(1)) if single_buffer else {}
        return [
            pl.BlockSpec((d_in_p, h_p), lambda i: (0, 0), **kw),
            pl.BlockSpec((1, h_p), lambda i: (0, 0), **kw),
            pl.BlockSpec((h_p, c_p), lambda i: (0, 0), **kw),
            pl.BlockSpec((1, c_p), lambda i: (0, 0), **kw),
        ]

    def _run(single_buffer_weights):
        return pl.pallas_call(
            tensorized_net_kernel,
            out_shape=jax.ShapeDtypeStruct((n_p, c_p), jnp.float32),
            grid_spec=pltpu.PrefetchScalarGridSpec(
                num_scalar_prefetch=0,
                grid=grid,
                in_specs=[x_spec] + _weight_specs(single_buffer_weights),
                out_specs=out_spec,
            ),
            compiler_params=pltpu.CompilerParams(
                dimension_semantics=("parallel",),   # megacore on v7x
                vmem_limit_bytes=vmem_limit,
            ),
            cost_estimate=cost,
        )(x_p, w1_p, b1_p, w2_p, b2_p)

    try:
        out_p = _run(True)
    except Exception:
        # Fallback if pl.Buffered(1) single-buffering is rejected by this
        # jax/Mosaic build: let the weights use default double-buffering.
        out_p = _run(False)

    return out_p[:n, :n_cls]


if __name__ == "__main__":
    # Small shapes consistent with the module: MNIST-like image into fc1.
    N, C, H, W = 2, 1, 16, 16          # (2, 1, 16, 16) -> flatten to (2, 256)
    D_IN = C * H * W
    HIDDEN = 32
    N_CLASSES = 10

    key = jax.random.PRNGKey(0)
    kx, k1, kb1, k2, kb2 = jax.random.split(key, 5)

    x = jax.random.normal(kx, (N, C, H, W), dtype=jnp.float32)

    # Weights stored as (in, out): kernel computes x @ W + b, equivalent to
    # PyTorch's x @ W.T + b with W stored (out, in).
    w1 = jax.random.normal(k1, (D_IN, HIDDEN), dtype=jnp.float32) * 0.05
    b1 = jax.random.normal(kb1, (HIDDEN,), dtype=jnp.float32) * 0.05
    w2 = jax.random.normal(k2, (HIDDEN, N_CLASSES), dtype=jnp.float32) * 0.05
    b2 = jax.random.normal(kb2, (N_CLASSES,), dtype=jnp.float32) * 0.05

    # Weight prep (padding + bf16 cast + bias-baked class mask) done once.
    params = prepare_tensorized_net_params(w1, b1, w2, b2)

    out = jax.block_until_ready(tensorized_net_forward(x, params))
    assert out.shape == (N, N_CLASSES), out.shape

    # Reference in plain JAX with matched precision:
    # bf16 matmul inputs, f32 accumulation, f32 elementwise (eval-mode dropout).
    xf = x.reshape(N, -1)
    h_ref = jnp.maximum(
        jnp.dot(xf.astype(jnp.bfloat16), w1.astype(jnp.bfloat16),
                preferred_element_type=jnp.float32) + b1, 0.0)
    logits_ref = jnp.dot(h_ref.astype(jnp.bfloat16), w2.astype(jnp.bfloat16),
                         preferred_element_type=jnp.float32) + b2
    ref = jax.nn.log_softmax(logits_ref, axis=1)

    assert jnp.allclose(out, ref, atol=1e-4, rtol=1e-4), (
        "mismatch vs reference: max abs err = "
        f"{float(jnp.max(jnp.abs(out - ref)))}")

    print("KERNEL_OK")
</pallas_src>

<mosaic_0001>
module attributes {stable_mosaic.version = 11 : i64} {
  func.func @tensorized_net_kernel(%arg0: i32, %arg1: memref<8x256xbf16, #tpu.memory_space<vmem>>, %arg2: memref<256x128xbf16, #tpu.memory_space<vmem>>, %arg3: memref<1x128xf32, #tpu.memory_space<vmem>>, %arg4: memref<128x128xbf16, #tpu.memory_space<vmem>>, %arg5: memref<1x128xf32, #tpu.memory_space<vmem>>, %arg6: memref<8x128xf32, #tpu.memory_space<vmem>>) attributes {dimension_semantics = [#tpu.dimension_semantics<parallel>], iteration_bounds = array<i64: 1>, scalar_prefetch = 0 : i64, scratch_operands = 0 : i64, tpu.core_type = #tpu.core_type<tc>, window_params = [{transform_indices = @transform_0, window_bounds = array<i64: 8, 256>}, {pipeline_mode = #tpu.pipeline_mode<synchronous>, transform_indices = @transform_1, window_bounds = array<i64: 256, 128>}, {pipeline_mode = #tpu.pipeline_mode<synchronous>, transform_indices = @transform_2, window_bounds = array<i64: 1, 128>}, {pipeline_mode = #tpu.pipeline_mode<synchronous>, transform_indices = @transform_3, window_bounds = array<i64: 128, 128>}, {pipeline_mode = #tpu.pipeline_mode<synchronous>, transform_indices = @transform_4, window_bounds = array<i64: 1, 128>}, {transform_indices = @transform_5, window_bounds = array<i64: 8, 128>}]} {
    %c0 = arith.constant 0 : index
    %c0_0 = arith.constant 0 : index
    %0 = vector.load %arg1[%c0, %c0_0] : memref<8x256xbf16, #tpu.memory_space<vmem>>, vector<8x256xbf16>
    %c0_1 = arith.constant 0 : index
    %c0_2 = arith.constant 0 : index
    %1 = vector.load %arg2[%c0_1, %c0_2] : memref<256x128xbf16, #tpu.memory_space<vmem>>, vector<256x128xbf16>
    %cst = arith.constant dense<0.000000e+00> : vector<8x128xf32>
    %2 = tpu.matmul %0, %1, %cst {dimension_numbers = #tpu.dot_dimension_numbers<[1], [0], [0], [1], [0, 0, 1, 1], [], []>} : vector<8x256xbf16>, vector<256x128xbf16>, vector<8x128xf32> -> vector<8x128xf32>
    %c0_3 = arith.constant 0 : index
    %c0_4 = arith.constant 0 : index
    %3 = vector.load %arg3[%c0_3, %c0_4] : memref<1x128xf32, #tpu.memory_space<vmem>>, vector<1x128xf32>
    %4 = vector.broadcast %3 : vector<1x128xf32> to vector<8x128xf32>
    %5 = arith.addf %2, %4 : vector<8x128xf32>
    %cst_5 = arith.constant 0.000000e+00 : f32
    %6 = vector.broadcast %cst_5 : f32 to vector<8x128xf32>
    %7 = arith.maximumf %5, %6 : vector<8x128xf32>
    %8 = arith.truncf %7 : vector<8x128xf32> to vector<8x128xbf16>
    %c0_6 = arith.constant 0 : index
    %c0_7 = arith.constant 0 : index
    %9 = vector.load %arg4[%c0_6, %c0_7] : memref<128x128xbf16, #tpu.memory_space<vmem>>, vector<128x128xbf16>
    %cst_8 = arith.constant dense<0.000000e+00> : vector<8x128xf32>
    %10 = tpu.matmul %8, %9, %cst_8 {dimension_numbers = #tpu.dot_dimension_numbers<[1], [0], [0], [1], [0, 0, 1, 1], [], []>} : vector<8x128xbf16>, vector<128x128xbf16>, vector<8x128xf32> -> vector<8x128xf32>
    %c0_9 = arith.constant 0 : index
    %c0_10 = arith.constant 0 : index
    %11 = vector.load %arg5[%c0_9, %c0_10] : memref<1x128xf32, #tpu.memory_space<vmem>>, vector<1x128xf32>
    %12 = vector.broadcast %11 : vector<1x128xf32> to vector<8x128xf32>
    %13 = arith.addf %10, %12 : vector<8x128xf32>
    %cst_11 = arith.constant dense<0xFF800000> : vector<8xf32>
    %14 = vector.multi_reduction <maximumf>, %13, %cst_11 [1] : vector<8x128xf32> to vector<8xf32>
    %15 = vector.shape_cast %14 : vector<8xf32> to vector<8x1xf32>
    %16 = vector.broadcast %15 : vector<8x1xf32> to vector<8x128xf32>
    %17 = arith.subf %13, %16 : vector<8x128xf32>
    %18 = math.exp %17 : vector<8x128xf32>
    %cst_12 = arith.constant dense<0.000000e+00> : vector<8xf32>
    %19 = vector.multi_reduction <add>, %18, %cst_12 [1] : vector<8x128xf32> to vector<8xf32>
    %20 = vector.shape_cast %19 : vector<8xf32> to vector<8x1xf32>
    %21 = math.log %20 : vector<8x1xf32>
    %22 = vector.broadcast %21 : vector<8x1xf32> to vector<8x128xf32>
    %23 = arith.subf %17, %22 : vector<8x128xf32>
    %c0_13 = arith.constant 0 : index
    %c0_14 = arith.constant 0 : index
    %24 = vector.load %arg6[%c0_13, %c0_14] : memref<8x128xf32, #tpu.memory_space<vmem>>, vector<8x128xf32>
    tpu.vector_store %arg6[%c0_13, %c0_14], %23 {strides = array<i32>} : memref<8x128xf32, #tpu.memory_space<vmem>>, vector<8x128xf32>,
    return
  }
  func.func @transform_0(%arg0: i32) -> (i32, i32) {
    %c0_i32 = arith.constant 0 : i32
    %c0_i32_0 = arith.constant 0 : i32
    return %arg0, %c0_i32 : i32, i32
  }
  func.func @transform_1(%arg0: i32) -> (i32, i32) {
    %c0_i32 = arith.constant 0 : i32
    %c0_i32_0 = arith.constant 0 : i32
    %c0_i32_1 = arith.constant 0 : i32
    return %c0_i32, %c0_i32_0 : i32, i32
  }
  func.func @transform_2(%arg0: i32) -> (i32, i32) {
    %c0_i32 = arith.constant 0 : i32
    %c0_i32_0 = arith.constant 0 : i32
    %c0_i32_1 = arith.constant 0 : i32
    return %c0_i32, %c0_i32_0 : i32, i32
  }
  func.func @transform_3(%arg0: i32) -> (i32, i32) {
    %c0_i32 = arith.constant 0 : i32
    %c0_i32_0 = arith.constant 0 : i32
    %c0_i32_1 = arith.constant 0 : i32
    return %c0_i32, %c0_i32_0 : i32, i32
  }
  func.func @transform_4(%arg0: i32) -> (i32, i32) {
    %c0_i32 = arith.constant 0 : i32
    %c0_i32_0 = arith.constant 0 : i32
    %c0_i32_1 = arith.constant 0 : i32
    return %c0_i32, %c0_i32_0 : i32, i32
  }
  func.func @transform_5(%arg0: i32) -> (i32, i32) {
    %c0_i32 = arith.constant 0 : i32
    %c0_i32_0 = arith.constant 0 : i32
    return %arg0, %c0_i32 : i32, i32
  }
}

module attributes {stable_mosaic.version = 11 : i64} {
  func.func @tensorized_net_kernel(%arg0: i32, %arg1: memref<8x256xbf16, #tpu.memory_space<vmem>>, %arg2: memref<256x128xbf16, #tpu.memory_space<vmem>>, %arg3: memref<1x128xf32, #tpu.memory_space<vmem>>, %arg4: memref<128x128xbf16, #tpu.memory_space<vmem>>, %arg5: memref<1x128xf32, #tpu.memory_space<vmem>>, %arg6: memref<8x128xf32, #tpu.memory_space<vmem>>) attributes {dimension_semantics = [#tpu.dimension_semantics<parallel>], iteration_bounds = array<i64: 1>, scalar_prefetch = 0 : i64, scratch_operands = 0 : i64, tpu.core_type = #tpu.core_type<tc>, window_params = [{transform_indices = @transform_0, window_bounds = array<i64: 8, 256>}, {pipeline_mode = #tpu.pipeline_mode<synchronous>, transform_indices = @transform_1, window_bounds = array<i64: 256, 128>}, {pipeline_mode = #tpu.pipeline_mode<synchronous>, transform_indices = @transform_2, window_bounds = array<i64: 1, 128>}, {pipeline_mode = #tpu.pipeline_mode<synchronous>, transform_indices = @transform_3, window_bounds = array<i64: 128, 128>}, {pipeline_mode = #tpu.pipeline_mode<synchronous>, transform_indices = @transform_4, window_bounds = array<i64: 1, 128>}, {transform_indices = @transform_5, window_bounds = array<i64: 8, 128>}]} {
    %c0 = arith.constant 0 : index
    %c0_0 = arith.constant 0 : index
    %0 = vector.load %arg1[%c0, %c0_0] : memref<8x256xbf16, #tpu.memory_space<vmem>>, vector<8x256xbf16>
    %c0_1 = arith.constant 0 : index
    %c0_2 = arith.constant 0 : index
    %1 = vector.load %arg2[%c0_1, %c0_2] : memref<256x128xbf16, #tpu.memory_space<vmem>>, vector<256x128xbf16>
    %cst = arith.constant dense<0.000000e+00> : vector<8x128xf32>
    %2 = tpu.matmul %0, %1, %cst {dimension_numbers = #tpu.dot_dimension_numbers<[1], [0], [0], [1], [0, 0, 1, 1], [], []>} : vector<8x256xbf16>, vector<256x128xbf16>, vector<8x128xf32> -> vector<8x128xf32>
    %c0_3 = arith.constant 0 : index
    %c0_4 = arith.constant 0 : index
    %3 = vector.load %arg3[%c0_3, %c0_4] : memref<1x128xf32, #tpu.memory_space<vmem>>, vector<1x128xf32>
    %4 = vector.broadcast %3 : vector<1x128xf32> to vector<8x128xf32>
    %5 = arith.addf %2, %4 : vector<8x128xf32>
    %cst_5 = arith.constant 0.000000e+00 : f32
    %6 = vector.broadcast %cst_5 : f32 to vector<8x128xf32>
    %7 = arith.maximumf %5, %6 : vector<8x128xf32>
    %8 = arith.truncf %7 : vector<8x128xf32> to vector<8x128xbf16>
    %c0_6 = arith.constant 0 : index
    %c0_7 = arith.constant 0 : index
    %9 = vector.load %arg4[%c0_6, %c0_7] : memref<128x128xbf16, #tpu.memory_space<vmem>>, vector<128x128xbf16>
    %cst_8 = arith.constant dense<0.000000e+00> : vector<8x128xf32>
    %10 = tpu.matmul %8, %9, %cst_8 {dimension_numbers = #tpu.dot_dimension_numbers<[1], [0], [0], [1], [0, 0, 1, 1], [], []>} : vector<8x128xbf16>, vector<128x128xbf16>, vector<8x128xf32> -> vector<8x128xf32>
    %c0_9 = arith.constant 0 : index
    %c0_10 = arith.constant 0 : index
    %11 = vector.load %arg5[%c0_9, %c0_10] : memref<1x128xf32, #tpu.memory_space<vmem>>, vector<1x128xf32>
    %12 = vector.broadcast %11 : vector<1x128xf32> to vector<8x128xf32>
    %13 = arith.addf %10, %12 : vector<8x128xf32>
    %cst_11 = arith.constant dense<0xFF800000> : vector<8xf32>
    %14 = vector.multi_reduction <maximumf>, %13, %cst_11 [1] : vector<8x128xf32> to vector<8xf32>
    %15 = vector.shape_cast %14 : vector<8xf32> to vector<8x1xf32>
    %16 = vector.broadcast %15 : vector<8x1xf32> to vector<8x128xf32>
    %17 = arith.subf %13, %16 : vector<8x128xf32>
    %18 = math.exp %17 : vector<8x128xf32>
    %cst_12 = arith.constant dense<0.000000e+00> : vector<8xf32>
    %19 = vector.multi_reduction <add>, %18, %cst_12 [1] : vector<8x128xf32> to vector<8xf32>
    %20 = vector.shape_cast %19 : vector<8xf32> to vector<8x1xf32>
    %21 = math.log %20 : vector<8x1xf32>
    %22 = vector.broadcast %21 : vector<8x1xf32> to vector<8x128xf32>
    %23 = arith.subf %17, %22 : vector<8x128xf32>
    %c0_13 = arith.constant 0 : index
    %c0_14 = arith.constant 0 : index
    %24 = vector.load %arg6[%c0_13, %c0_14] : memref<8x128xf32, #tpu.memory_space<vmem>>, vector<8x128xf32>
    tpu.vector_store %arg6[%c0_13, %c0_14], %23 {strides = array<i32>} : memref<8x128xf32, #tpu.memory_space<vmem>>, vector<8x128xf32>,
    return
  }
  func.func @transform_0(%arg0: i32) -> (i32, i32) {
    %c0_i32 = arith.constant 0 : i32
    %c0_i32_0 = arith.constant 0 : i32
    return %arg0, %c0_i32 : i32, i32
  }
  func.func @transform_1(%arg0: i32) -> (i32, i32) {
    %c0_i32 = arith.constant 0 : i32
    %c0_i32_0 = arith.constant 0 : i32
    %c0_i32_1 = arith.constant 0 : i32
    return %c0_i32, %c0_i32_0 : i32, i32
  }
  func.func @transform_2(%arg0: i32) -> (i32, i32) {
    %c0_i32 = arith.constant 0 : i32
    %c0_i32_0 = arith.constant 0 : i32
    %c0_i32_1 = arith.constant 0 : i32
    return %c0_i32, %c0_i32_0 : i32, i32
  }
  func.func @transform_3(%arg0: i32) -> (i32, i32) {
    %c0_i32 = arith.constant 0 : i32
    %c0_i32_0 = arith.constant 0 : i32
    %c0_i32_1 = arith.constant 0 : i32
    return %c0_i32, %c0_i32_0 : i32, i32
  }
  func.func @transform_4(%arg0: i32) -> (i32, i32) {
    %c0_i32 = arith.constant 0 : i32
    %c0_i32_0 = arith.constant 0 : i32
    %c0_i32_1 = arith.constant 0 : i32
    return %c0_i32, %c0_i32_0 : i32, i32
  }
  func.func @transform_5(%arg0: i32) -> (i32, i32) {
    %c0_i32 = arith.constant 0 : i32
    %c0_i32_0 = arith.constant 0 : i32
    return %arg0, %c0_i32 : i32, i32
  }
}

</mosaic_0001>

<bundles_post_ra>
// kernel: tpu_custom_call.1
= control target key start
LH: loop header
LB: loop body
LE: loop exit
PB: predicated region body
PF: predicated region fallthrough
CT: control target
= control target key end

     0   :  { %10 = vsyncpa [#allocation3], 0  ;;  %s702_s0 = inlined_call_operand.hbm [shape: bf16[8,256], index: 0, kind: input, shape index: {}]   ;;  %s703_s1 = inlined_call_operand.hbm [shape: bf16[256,128], index: 1, kind: input, shape index: {}]   ;;  %s704_s2 = inlined_call_operand.vmem [shape: f32[1,128], index: 2, kind: input, shape index: {}]   ;;  %s705_s3 = inlined_call_operand.hbm [shape: bf16[128,128], index: 3, kind: input, shape index: {}]   ;;  %s706_s4 = inlined_call_operand.vmem [shape: f32[1,128], index: 4, kind: input, shape index: {}]   ;;  %s707_s5 = inlined_call_operand.hbm [shape: f32[8,128], index: 5, kind: output, shape index: {}]  }
   0x1   :  { %11 = vsyncpa [#allocation6], 0 }
   0x2   :  { %12 = vsyncpa [#allocation4], 0  ;;  %s595_s18 = smov [#allocation5]   ;;  %s501_s22 = scalar_lea.hbm %s703_s1, 2048 }
   0x3   :  { %s28_s19 = sshll.u32 %s595_s18, 4  ;;  %p502_p0 = scmp.ne.s32.totalorder %s703_s1, %s501_s22  ;;  %s29_s19 = int_to_ptr.vmem [resolvable:$true] %s28_s19 }
   0x4   :  { %p505_p1 = scmp.lt.u32.totalorder %s501_s22, %s703_s1 }
   0x6   :  { %p507_p2 = pnand %p505_p1, %p502_p0 }
   0x8   :  { %510 = shalt.err (!%p507_p2)
}
   0x9   :  { %s511_s27 = scalar_lea.vmem %s29_s19, 2048  ;;  %p516_p4 = scmp.lt.s32.totalorder %s29_s19, %s29_s19 }
   0xa   :  { %p512_p3 = scmp.ne.s32.totalorder %s29_s19, %s511_s27  ;;  %p517_p5 = scmp.lt.s32.totalorder %s511_s27, %s511_s27 }
   0xc   :  { %p518_p6 = por %p517_p5, %p516_p4 }
   0xe   :  { %p519_p7 = pnand %p518_p6, %p512_p3 }
  0x10   :  { %522 = shalt.err (!%p519_p7)
}
  0x11   :  { %s596_s28 = smov 64   ;;  %s597_s29 = smov 4  }
  0x12   :  { %34 = dma.hbm_to_vmem [thread:$0]  %s703_s1, 2048, %s29_s19, [#allocation6], %s596_s28, %s596_s28, %s597_s29  }
  0x13   :  { %s598_s7 = smov [#allocation2]   ;;  %s599_s9 = smov [#allocation7]  }
  0x14   :  { %s19_s8 = sshll.u32 %s598_s7, 4  ;;  %s42_s10 = sshll.u32 %s599_s9, 4  ;;  %s20_s8 = int_to_ptr.vmem [resolvable:$true] %s19_s8  ;;  %s43_s10 = int_to_ptr.vmem [resolvable:$true] %s42_s10 }
  0x15   :  { %s523_s13 = scalar_lea.hbm %s702_s0, 128 }
  0x16   :  { %p524_p8 = scmp.ne.s32.totalorder %s702_s0, %s523_s13  ;;  %p527_p9 = scmp.lt.u32.totalorder %s523_s13, %s702_s0 }
  0x18   :  { %p529_p10 = pnand %p527_p9, %p524_p8 }
  0x1a   :  { %532 = shalt.err (!%p529_p10)
}
  0x1b   :  { %s533_s1 = scalar_lea.vmem %s20_s8, 128  ;;  %p538_p12 = scmp.lt.s32.totalorder %s20_s8, %s20_s8 }
  0x1c   :  { %p534_p11 = scmp.ne.s32.totalorder %s20_s8, %s533_s1  ;;  %p539_p13 = scmp.lt.s32.totalorder %s533_s1, %s533_s1 }
  0x1e   :  { %p540_p0 = por %p539_p13, %p538_p12 }
  0x20   :  { %p541_p1 = pnand %p540_p0, %p534_p11 }
  0x22   :  { %544 = shalt.err (!%p541_p1)
}
  0x23   :  { %22 = dma.hbm_to_vmem [thread:$0]  %s702_s0, 128, %s20_s8, [#allocation3]  }
  0x24   :  { %s545_s22 = scalar_lea.hbm %s705_s3, 1024 }
  0x25   :  { %p546_p2 = scmp.ne.s32.totalorder %s705_s3, %s545_s22  ;;  %p549_p3 = scmp.lt.u32.totalorder %s545_s22, %s705_s3 }
  0x27   :  { %p551_p4 = pnand %p549_p3, %p546_p2 }
  0x29   :  { %554 = shalt.err (!%p551_p4)
}
  0x2a   :  { %s555_s27 = scalar_lea.vmem %s43_s10, 1024  ;;  %p560_p6 = scmp.lt.s32.totalorder %s43_s10, %s43_s10 }
  0x2b   :  { %p556_p5 = scmp.ne.s32.totalorder %s43_s10, %s555_s27  ;;  %p561_p7 = scmp.lt.s32.totalorder %s555_s27, %s555_s27 }
  0x2d   :  { %p562_p8 = por %p561_p7, %p560_p6 }
  0x2f   :  { %p563_p9 = pnand %p562_p8, %p556_p5 }
  0x31   :  { %566 = shalt.err (!%p563_p9)
}
  0x32   :  { %48 = dma.hbm_to_vmem [thread:$0]  %s705_s3, 1024, %s43_s10, [#allocation6], %s596_s28, %s596_s28, %s597_s29  }
  0x33   :  { %589 = dma.done.wait [#allocation3], 128  }
  0x34   :  { %590 = vsyncadd [#allocation3], 4294967168 }
  0x35   :  { %591 = dma.done.wait [#allocation6], 3072  }
  0x36   :  { %592 = vsyncadd [#allocation6], 4294964224  ;;  %v600_v0 = vmov 0.0   ;;  %v471_v1 = vld [vmem:[#allocation5 + $0x40] sm:$0xff]   ;;  %v473_v3 = vld [vmem:[#allocation5 + $0x48] sm:$0xff]   ;;  %vm601_vm0 = vmmov 0  }
  0x37   :  { %443 = vmatprep.subr.bf16.mxu1 %v600_v0  ;;  %v472_v2 = vld [vmem:[#allocation5] sm:$0xff]   ;;  %412 = vmatprep.subr.bf16.mxu0 %v471_v1  ;;  %v474_v4 = vld [vmem:[#allocation5 + $0x8] sm:$0xff]   ;;  %v475_v5 = vld [vmem:[#allocation5 + $0x50] sm:$0xff]  }
  0x38   :  { %413 = vmatpush3.bf16.msra.mxu0 %v472_v2  ;;  %v476_v6 = vld [vmem:[#allocation5 + $0x10] sm:$0xff]   ;;  %v477_v7 = vld [vmem:[#allocation5 + $0x58] sm:$0xff]   ;;  %v479_v9 = vld [vmem:[#allocation5 + $0x60] sm:$0xff]   ;;  %459 = vmatprep.mubr.msk.bf16.mxu1 %vm601_vm0, %v600_v0 }
  0x39   :  { %414 = vmatprep.subr.bf16.mxu0 %v473_v3  ;;  %v478_v8 = vld [vmem:[#allocation5 + $0x18] sm:$0xff]   ;;  %v480_v10 = vld [vmem:[#allocation5 + $0x20] sm:$0xff]   ;;  %v481_v11 = vld [vmem:[#allocation5 + $0x68] sm:$0xff]  }
  0x3a   :  { %v61_v12 = vld [vmem:[#allocation2] sm:$0xff]  ;;  %v489_v14 = vld [vmem:[#allocation7] sm:$0xff]   ;;  %v482_v15 = vld [vmem:[#allocation5 + $0x28] sm:$0xff]  }
  0x3b   :  { %v386_v13 = vcombine.high %v61_v12, %v61_v12  ;;  %v483_v16 = vld [vmem:[#allocation5 + $0x70] sm:$0xff]   ;;  %444 = vmatpush3.bf16.msra.mxu1 %v489_v14  ;;  %v490_v17 = vld [vmem:[#allocation7 + $0x8] sm:$0xff]   ;;  %v485_v19 = vld [vmem:[#allocation5 + $0x78] sm:$0xff]   ;;  %v385_v23 = vcombine.low %v61_v12, %v61_v12 }
  0x3c   :  { %415 = vmatpush3.bf16.msra.mxu0 %v474_v4  ;;  %445 = vmatprep.subr.bf16.mxu1 %v600_v0  ;;  %v484_v18 = vld [vmem:[#allocation5 + $0x30] sm:$0xff]   ;;  %v486_v21 = vld [vmem:[#allocation5 + $0x38] sm:$0xff]   ;;  %v493_v24 = vld [vmem:[#allocation7 + $0x20] sm:$0xff]  }
  0x3d   :  { %416 = vmatprep.subr.bf16.mxu0 %v475_v5  ;;  %236 = vmatprep.mubr.bf16.mxu0 %v386_v13  ;;  %v491_v20 = vld [vmem:[#allocation7 + $0x10] sm:$0xff]   ;;  %v492_v22 = vld [vmem:[#allocation7 + $0x18] sm:$0xff]   ;;  %v494_v25 = vld [vmem:[#allocation7 + $0x28] sm:$0xff]  }
  0x3e   :  { %v495_v26 = vld [vmem:[#allocation7 + $0x30] sm:$0xff]   ;;  %v496_v27 = vld [vmem:[#allocation7 + $0x38] sm:$0xff]  }
  0x3f   :  { %446 = vmatpush3.bf16.msra.mxu1 %v490_v17  ;;  %v384_v29 = vld [vmem:[%s704_s2] ss:$0 sm:$0xff]  ;;  %s602_s2 = smov [#allocation8]  }
  0x40   :  { %417 = vmatpush3.bf16.msra.mxu0 %v476_v6  ;;  %447 = vmatprep.subr.bf16.mxu1 %v600_v0  ;;  %v403_v37 = vld [vmem:[%s706_s4] ss:$0 sm:$0xff]  ;;  %s374_s7 = sshll.u32 %s602_s2, 4  ;;  %s375_s7 = int_to_ptr.vmem [resolvable:$true] %s374_s7 }
  0x41   :  { %418 = vmatprep.subr.bf16.mxu0 %v477_v7  ;;  %s567_s4 = scalar_lea.vmem %s375_s7, 128  ;;  %p572_p11 = scmp.lt.s32.totalorder %s375_s7, %s375_s7 }
  0x42   :  { %p568_p10 = scmp.ne.s32.totalorder %s375_s7, %s567_s4  ;;  %p573_p12 = scmp.lt.s32.totalorder %s567_s4, %s567_s4 }
  0x43   :  { %448 = vmatpush3.bf16.msra.mxu1 %v491_v20 }
  0x44   :  { %419 = vmatpush3.bf16.msra.mxu0 %v478_v8  ;;  %449 = vmatprep.subr.bf16.mxu1 %v600_v0  ;;  %p574_p13 = por %p573_p12, %p572_p11 }
  0x45   :  { %420 = vmatprep.subr.bf16.mxu0 %v479_v9 }
  0x46   :  { %p575_p0 = pnand %p574_p13, %p568_p10 }
  0x47   :  { %450 = vmatpush3.bf16.msra.mxu1 %v492_v22 }
  0x48   :  { %421 = vmatpush3.bf16.msra.mxu0 %v480_v10  ;;  %451 = vmatprep.subr.bf16.mxu1 %v600_v0 }
  0x49   :  { %422 = vmatprep.subr.bf16.mxu0 %v481_v11 }
  0x4b   :  { %452 = vmatpush3.bf16.msra.mxu1 %v493_v24 }
  0x4c   :  { %423 = vmatpush3.bf16.msra.mxu0 %v482_v15  ;;  %453 = vmatprep.subr.bf16.mxu1 %v600_v0 }
  0x4d   :  { %424 = vmatprep.subr.bf16.mxu0 %v483_v16 }
  0x4f   :  { %454 = vmatpush3.bf16.msra.mxu1 %v494_v25 }
  0x50   :  { %425 = vmatpush3.bf16.msra.mxu0 %v484_v18  ;;  %455 = vmatprep.subr.bf16.mxu1 %v600_v0 }
  0x51   :  { %426 = vmatprep.subr.bf16.mxu0 %v485_v19 }
  0x53   :  { %456 = vmatpush3.bf16.msra.mxu1 %v495_v26 }
  0x54   :  { %427 = vmatpush3.bf16.msra.mxu0 %v486_v21  ;;  %457 = vmatprep.subr.bf16.mxu1 %v600_v0 }
  0x57   :  { %237 = vmatmul.mubr.bf16.vlgmr.msra.gmra.mrb[0].mxu0 %v385_v23  ;;  %458 = vmatpush3.bf16.msra.mxu1 %v496_v27 }
 0x12a   :  { %v428_v28 = vpop.f32.mrb[0].mxu0 }
 0x12b   :  { %v429_v30 = vpop.f32.mrb[1].mxu0 }
 0x12c   :  { %v430_v31 = vadd.f32 %v429_v30, %v428_v28  ;;  %v431_v32 = vpop.f32.mrb[2].mxu0 }
 0x12d   :  { %v432_v33 = vpop.f32.mrb[3].mxu0 }
 0x12e   :  { %v239_v34 = vadd.f32 %v430_v31, %v384_v29 }
 0x130   :  { %v244_v35 = vmax.f32 %v239_v34, 0.0 }
 0x132   :  { %v245_v36 = vpack.c.bf16 %v244_v35, %v244_v35 }
 0x134   :  { %460 = vmatmul.mubr.bf16.vlgmr.msra.gmra.mrb[0].mxu1 %v245_v36 }
 0x207   :  { %v351_v38 = vpop.f32.mrb[0].mxu1 }
 0x208   :  { %v352_v39 = vadd.f32 %v403_v37, %v351_v38  ;;  %v461_v40 = vpop.f32.mrb[1].mxu1 }
 0x209   :  { %v354_v41 = vpop.f32.mrb[2].mxu1 }
 0x20a   :  { %357 = vmax.xlane.f32.xlu0 %v352_v39  ;;  %v462_v42 = vpop.f32.mrb[3].mxu1 }
 0x297   :  { %v358_v43 = vpop.xlane.xlu0 %357 }
 0x298   :  { %v359_v44 = vsub.f32 %v352_v39, %v358_v43 }
 0x29a   :  { %v360_v45 = vmul.f32 1.442695, %v359_v44 }
 0x29c   :  { %497 = vpow2.f32 %v360_v45 }
 0x2a6   :  { %v498_v46 = vpop.eup %497 }
 0x2a7   :  { %362 = vadd.xlane.f32.xlu0 %v498_v46 }
 0x334   :  { %v363_v47 = vpop.xlane.xlu0 %362 }
 0x335   :  { %499 = vlog2.f32 %v363_v47 }
 0x33f   :  { %v500_v48 = vpop.eup %499 }
 0x340   :  { %v365_v49 = vmul.f32 0.6931472, %v500_v48 }
 0x342   :  { %v366_v50 = vsub.f32 %v359_v44, %v365_v49 }
 0x344   :  { %367 = vst [vmem:[#allocation8] sm:$0xff] %v366_v50 }
 0x345   :  { %578 = shalt.err (!%p575_p0)
}
 0x346   :  { %s579_s10 = scalar_lea.hbm %s707_s5, 128 }
 0x347   :  { %p580_p1 = scmp.ne.s32.totalorder %s707_s5, %s579_s10  ;;  %p583_p2 = scmp.lt.u32.totalorder %s579_s10, %s707_s5 }
 0x349   :  { %p585_p3 = pnand %p583_p2, %p580_p1 }
 0x34b   :  { %588 = shalt.err (!%p585_p3)
}
 0x34c   :  { %377 = dma.vmem_to_hbm [thread:$0]  %s375_s7, 128, %s707_s5, [#allocation4]  }
 0x34d   :  { %593 = dma.done.wait [#allocation4], 128  }
 0x34e   :  { %594 = vsyncadd [#allocation4], 4294967168 }
 0x34f   :  { %381 = vsyncpa [#allocation3], 1 }
 0x350   :  { %382 = vsyncpa [#allocation6], 1 }
 0x351   :  { %383 = vsyncpa [#allocation4], 1 }

// kernel: tpu_custom_call.1
= control target key start
LH: loop header
LB: loop body
LE: loop exit
PB: predicated region body
PF: predicated region fallthrough
CT: control target
= control target key end

     0   :  { %10 = vsyncpa [#allocation3], 0  ;;  %s702_s0 = inlined_call_operand.hbm [shape: bf16[8,256], index: 0, kind: input, shape index: {}]   ;;  %s703_s1 = inlined_call_operand.hbm [shape: bf16[256,128], index: 1, kind: input, shape index: {}]   ;;  %s704_s2 = inlined_call_operand.vmem [shape: f32[1,128], index: 2, kind: input, shape index: {}]   ;;  %s705_s3 = inlined_call_operand.hbm [shape: bf16[128,128], index: 3, kind: input, shape index: {}]   ;;  %s706_s4 = inlined_call_operand.vmem [shape: f32[1,128], index: 4, kind: input, shape index: {}]   ;;  %s707_s5 = inlined_call_operand.hbm [shape: f32[8,128], index: 5, kind: output, shape index: {}]  }
   0x1   :  { %11 = vsyncpa [#allocation6], 0 }
   0x2   :  { %12 = vsyncpa [#allocation4], 0  ;;  %s595_s18 = smov [#allocation5]   ;;  %s501_s22 = scalar_lea.hbm %s703_s1, 2048 }
   0x3   :  { %s28_s19 = sshll.u32 %s595_s18, 4  ;;  %p502_p0 = scmp.ne.s32.totalorder %s703_s1, %s501_s22  ;;  %s29_s19 = int_to_ptr.vmem [resolvable:$true] %s28_s19 }
   0x4   :  { %p505_p1 = scmp.lt.u32.totalorder %s501_s22, %s703_s1 }
   0x6   :  { %p507_p2 = pnand %p505_p1, %p502_p0 }
   0x8   :  { %510 = shalt.err (!%p507_p2)
}
   0x9   :  { %s511_s27 = scalar_lea.vmem %s29_s19, 2048  ;;  %p516_p4 = scmp.lt.s32.totalorder %s29_s19, %s29_s19 }
   0xa   :  { %p512_p3 = scmp.ne.s32.totalorder %s29_s19, %s511_s27  ;;  %p517_p5 = scmp.lt.s32.totalorder %s511_s27, %s511_s27 }
   0xc   :  { %p518_p6 = por %p517_p5, %p516_p4 }
   0xe   :  { %p519_p7 = pnand %p518_p6, %p512_p3 }
  0x10   :  { %522 = shalt.err (!%p519_p7)
}
  0x11   :  { %s596_s28 = smov 64   ;;  %s597_s29 = smov 4  }
  0x12   :  { %34 = dma.hbm_to_vmem [thread:$0]  %s703_s1, 2048, %s29_s19, [#allocation6], %s596_s28, %s596_s28, %s597_s29  }
  0x13   :  { %s598_s7 = smov [#allocation2]   ;;  %s599_s9 = smov [#allocation7]  }
  0x14   :  { %s19_s8 = sshll.u32 %s598_s7, 4  ;;  %s42_s10 = sshll.u32 %s599_s9, 4  ;;  %s20_s8 = int_to_ptr.vmem [resolvable:$true] %s19_s8  ;;  %s43_s10 = int_to_ptr.vmem [resolvable:$true] %s42_s10 }
  0x15   :  { %s523_s13 = scalar_lea.hbm %s702_s0, 128 }
  0x16   :  { %p524_p8 = scmp.ne.s32.totalorder %s702_s0, %s523_s13  ;;  %p527_p9 = scmp.lt.u32.totalorder %s523_s13, %s702_s0 }
  0x18   :  { %p529_p10 = pnand %p527_p9, %p524_p8 }
  0x1a   :  { %532 = shalt.err (!%p529_p10)
}
  0x1b   :  { %s533_s1 = scalar_lea.vmem %s20_s8, 128  ;;  %p538_p12 = scmp.lt.s32.totalorder %s20_s8, %s20_s8 }
  0x1c   :  { %p534_p11 = scmp.ne.s32.totalorder %s20_s8, %s533_s1  ;;  %p539_p13 = scmp.lt.s32.totalorder %s533_s1, %s533_s1 }
  0x1e   :  { %p540_p0 = por %p539_p13, %p538_p12 }
  0x20   :  { %p541_p1 = pnand %p540_p0, %p534_p11 }
  0x22   :  { %544 = shalt.err (!%p541_p1)
}
  0x23   :  { %22 = dma.hbm_to_vmem [thread:$0]  %s702_s0, 128, %s20_s8, [#allocation3]  }
  0x24   :  { %s545_s22 = scalar_lea.hbm %s705_s3, 1024 }
  0x25   :  { %p546_p2 = scmp.ne.s32.totalorder %s705_s3, %s545_s22  ;;  %p549_p3 = scmp.lt.u32.totalorder %s545_s22, %s705_s3 }
  0x27   :  { %p551_p4 = pnand %p549_p3, %p546_p2 }
  0x29   :  { %554 = shalt.err (!%p551_p4)
}
  0x2a   :  { %s555_s27 = scalar_lea.vmem %s43_s10, 1024  ;;  %p560_p6 = scmp.lt.s32.totalorder %s43_s10, %s43_s10 }
  0x2b   :  { %p556_p5 = scmp.ne.s32.totalorder %s43_s10, %s555_s27  ;;  %p561_p7 = scmp.lt.s32.totalorder %s555_s27, %s555_s27 }
  0x2d   :  { %p562_p8 = por %p561_p7, %p560_p6 }
  0x2f   :  { %p563_p9 = pnand %p562_p8, %p556_p5 }
  0x31   :  { %566 = shalt.err (!%p563_p9)
}
  0x32   :  { %48 = dma.hbm_to_vmem [thread:$0]  %s705_s3, 1024, %s43_s10, [#allocation6], %s596_s28, %s596_s28, %s597_s29  }
  0x33   :  { %589 = dma.done.wait [#allocation3], 128  }
  0x34   :  { %590 = vsyncadd [#allocation3], 4294967168 }
  0x35   :  { %591 = dma.done.wait [#allocation6], 3072  }
  0x36   :  { %592 = vsyncadd [#allocation6], 4294964224  ;;  %v600_v0 = vmov 0.0   ;;  %v471_v1 = vld [vmem:[#allocation5 + $0x40] sm:$0xff]   ;;  %v473_v3 = vld [vmem:[#allocation5 + $0x48] sm:$0xff]   ;;  %vm601_vm0 = vmmov 0  }
  0x37   :  { %443 = vmatprep.subr.bf16.mxu1 %v600_v0  ;;  %v472_v2 = vld [vmem:[#allocation5] sm:$0xff]   ;;  %412 = vmatprep.subr.bf16.mxu0 %v471_v1  ;;  %v474_v4 = vld [vmem:[#allocation5 + $0x8] sm:$0xff]   ;;  %v475_v5 = vld [vmem:[#allocation5 + $0x50] sm:$0xff]  }
  0x38   :  { %413 = vmatpush3.bf16.msra.mxu0 %v472_v2  ;;  %v476_v6 = vld [vmem:[#allocation5 + $0x10] sm:$0xff]   ;;  %v477_v7 = vld [vmem:[#allocation5 + $0x58] sm:$0xff]   ;;  %v479_v9 = vld [vmem:[#allocation5 + $0x60] sm:$0xff]   ;;  %459 = vmatprep.mubr.msk.bf16.mxu1 %vm601_vm0, %v600_v0 }
  0x39   :  { %414 = vmatprep.subr.bf16.mxu0 %v473_v3  ;;  %v478_v8 = vld [vmem:[#allocation5 + $0x18] sm:$0xff]   ;;  %v480_v10 = vld [vmem:[#allocation5 + $0x20] sm:$0xff]   ;;  %v481_v11 = vld [vmem:[#allocation5 + $0x68] sm:$0xff]  }
  0x3a   :  { %v61_v12 = vld [vmem:[#allocation2] sm:$0xff]  ;;  %v489_v14 = vld [vmem:[#allocation7] sm:$0xff]   ;;  %v482_v15 = vld [vmem:[#allocation5 + $0x28] sm:$0xff]  }
  0x3b   :  { %v386_v13 = vcombine.high %v61_v12, %v61_v12  ;;  %v483_v16 = vld [vmem:[#allocation5 + $0x70] sm:$0xff]   ;;  %444 = vmatpush3.bf16.msra.mxu1 %v489_v14  ;;  %v490_v17 = vld [vmem:[#allocation7 + $0x8] sm:$0xff]   ;;  %v485_v19 = vld [vmem:[#allocation5 + $0x78] sm:$0xff]   ;;  %v385_v23 = vcombine.low %v61_v12, %v61_v12 }
  0x3c   :  { %415 = vmatpush3.bf16.msra.mxu0 %v474_v4  ;;  %445 = vmatprep.subr.bf16.mxu1 %v600_v0  ;;  %v484_v18 = vld [vmem:[#allocation5 + $0x30] sm:$0xff]   ;;  %v486_v21 = vld [vmem:[#allocation5 + $0x38] sm:$0xff]   ;;  %v493_v24 = vld [vmem:[#allocation7 + $0x20] sm:$0xff]  }
  0x3d   :  { %416 = vmatprep.subr.bf16.mxu0 %v475_v5  ;;  %236 = vmatprep.mubr.bf16.mxu0 %v386_v13  ;;  %v491_v20 = vld [vmem:[#allocation7 + $0x10] sm:$0xff]   ;;  %v492_v22 = vld [vmem:[#allocation7 + $0x18] sm:$0xff]   ;;  %v494_v25 = vld [vmem:[#allocation7 + $0x28] sm:$0xff]  }
  0x3e   :  { %v495_v26 = vld [vmem:[#allocation7 + $0x30] sm:$0xff]   ;;  %v496_v27 = vld [vmem:[#allocation7 + $0x38] sm:$0xff]  }
  0x3f   :  { %446 = vmatpush3.bf16.msra.mxu1 %v490_v17  ;;  %v384_v29 = vld [vmem:[%s704_s2] ss:$0 sm:$0xff]  ;;  %s602_s2 = smov [#allocation8]  }
  0x40   :  { %417 = vmatpush3.bf16.msra.mxu0 %v476_v6  ;;  %447 = vmatprep.subr.bf16.mxu1 %v600_v0  ;;  %v403_v37 = vld [vmem:[%s706_s4] ss:$0 sm:$0xff]  ;;  %s374_s7 = sshll.u32 %s602_s2, 4  ;;  %s375_s7 = int_to_ptr.vmem [resolvable:$true] %s374_s7 }
  0x41   :  { %418 = vmatprep.subr.bf16.mxu0 %v477_v7  ;;  %s567_s4 = scalar_lea.vmem %s375_s7, 128  ;;  %p572_p11 = scmp.lt.s32.totalorder %s375_s7, %s375_s7 }
  0x42   :  { %p568_p10 = scmp.ne.s32.totalorder %s375_s7, %s567_s4  ;;  %p573_p12 = scmp.lt.s32.totalorder %s567_s4, %s567_s4 }
  0x43   :  { %448 = vmatpush3.bf16.msra.mxu1 %v491_v20 }
  0x44   :  { %419 = vmatpush3.bf16.msra.mxu0 %v478_v8  ;;  %449 = vmatprep.subr.bf16.mxu1 %v600_v0  ;;  %p574_p13 = por %p573_p12, %p572_p11 }
  0x45   :  { %420 = vmatprep.subr.bf16.mxu0 %v479_v9 }
  0x46   :  { %p575_p0 = pnand %p574_p13, %p568_p10 }
  0x47   :  { %450 = vmatpush3.bf16.msra.mxu1 %v492_v22 }
  0x48   :  { %421 = vmatpush3.bf16.msra.mxu0 %v480_v10  ;;  %451 = vmatprep.subr.bf16.mxu1 %v600_v0 }
  0x49   :  { %422 = vmatprep.subr.bf16.mxu0 %v481_v11 }
  0x4b   :  { %452 = vmatpush3.bf16.msra.mxu1 %v493_v24 }
  0x4c   :  { %423 = vmatpush3.bf16.msra.mxu0 %v482_v15  ;;  %453 = vmatprep.subr.bf16.mxu1 %v600_v0 }
  0x4d   :  { %424 = vmatprep.subr.bf16.mxu0 %v483_v16 }
  0x4f   :  { %454 = vmatpush3.bf16.msra.mxu1 %v494_v25 }
  0x50   :  { %425 = vmatpush3.bf16.msra.mxu0 %v484_v18  ;;  %455 = vmatprep.subr.bf16.mxu1 %v600_v0 }
  0x51   :  { %426 = vmatprep.subr.bf16.mxu0 %v485_v19 }
  0x53   :  { %456 = vmatpush3.bf16.msra.mxu1 %v495_v26 }
  0x54   :  { %427 = vmatpush3.bf16.msra.mxu0 %v486_v21  ;;  %457 = vmatprep.subr.bf16.mxu1 %v600_v0 }
  0x57   :  { %237 = vmatmul.mubr.bf16.vlgmr.msra.gmra.mrb[0].mxu0 %v385_v23  ;;  %458 = vmatpush3.bf16.msra.mxu1 %v496_v27 }
 0x12a   :  { %v428_v28 = vpop.f32.mrb[0].mxu0 }
 0x12b   :  { %v429_v30 = vpop.f32.mrb[1].mxu0 }
 0x12c   :  { %v430_v31 = vadd.f32 %v429_v30, %v428_v28  ;;  %v431_v32 = vpop.f32.mrb[2].mxu0 }
 0x12d   :  { %v432_v33 = vpop.f32.mrb[3].mxu0 }
 0x12e   :  { %v239_v34 = vadd.f32 %v430_v31, %v384_v29 }
 0x130   :  { %v244_v35 = vmax.f32 %v239_v34, 0.0 }
 0x132   :  { %v245_v36 = vpack.c.bf16 %v244_v35, %v244_v35 }
 0x134   :  { %460 = vmatmul.mubr.bf16.vlgmr.msra.gmra.mrb[0].mxu1 %v245_v36 }
 0x207   :  { %v351_v38 = vpop.f32.mrb[0].mxu1 }
 0x208   :  { %v352_v39 = vadd.f32 %v403_v37, %v351_v38  ;;  %v461_v40 = vpop.f32.mrb[1].mxu1 }
 0x209   :  { %v354_v41 = vpop.f32.mrb[2].mxu1 }
 0x20a   :  { %357 = vmax.xlane.f32.xlu0 %v352_v39  ;;  %v462_v42 = vpop.f32.mrb[3].mxu1 }
 0x297   :  { %v358_v43 = vpop.xlane.xlu0 %357 }
 0x298   :  { %v359_v44 = vsub.f32 %v352_v39, %v358_v43 }
 0x29a   :  { %v360_v45 = vmul.f32 1.442695, %v359_v44 }
 0x29c   :  { %497 = vpow2.f32 %v360_v45 }
 0x2a6   :  { %v498_v46 = vpop.eup %497 }
 0x2a7   :  { %362 = vadd.xlane.f32.xlu0 %v498_v46 }
 0x334   :  { %v363_v47 = vpop.xlane.xlu0 %362 }
 0x335   :  { %499 = vlog2.f32 %v363_v47 }
 0x33f   :  { %v500_v48 = vpop.eup %499 }
 0x340   :  { %v365_v49 = vmul.f32 0.6931472, %v500_v48 }
 0x342   :  { %v366_v50 = vsub.f32 %v359_v44, %v365_v49 }
 0x344   :  { %367 = vst [vmem:[#allocation8] sm:$0xff] %v366_v50 }
 0x345   :  { %578 = shalt.err (!%p575_p0)
}
 0x346   :  { %s579_s10 = scalar_lea.hbm %s707_s5, 128 }
 0x347   :  { %p580_p1 = scmp.ne.s32.totalorder %s707_s5, %s579_s10  ;;  %p583_p2 = scmp.lt.u32.totalorder %s579_s10, %s707_s5 }
 0x349   :  { %p585_p3 = pnand %p583_p2, %p580_p1 }
 0x34b   :  { %588 = shalt.err (!%p585_p3)
}
 0x34c   :  { %377 = dma.vmem_to_hbm [thread:$0]  %s375_s7, 128, %s707_s5, [#allocation4]  }
 0x34d   :  { %593 = dma.done.wait [#allocation4], 128  }
 0x34e   :  { %594 = vsyncadd [#allocation4], 4294967168 }
 0x34f   :  { %381 = vsyncpa [#allocation3], 1 }
 0x350   :  { %382 = vsyncpa [#allocation6], 1 }
 0x351   :  { %383 = vsyncpa [#allocation4], 1 }

</bundles_post_ra>
